<compile_context>
chip_gen: v7x
topology: tpu7x:2x2x1
jax: 0.10.0
libtpu: 0.0.40
codegen_flags: <defaults>
</compile_context>

<pallas_src>
import jax
import jax.numpy as jnp
from jax.experimental import pallas as pl
from jax.experimental.pallas import tpu as pltpu


def _masked_sq_sum_kernel(len_ref,
                          dp_ref, dt_ref, pp_ref, pt_ref, ep_ref, et_ref,
                          d_out, p_out, e_out,
                          d_acc, p_acc, e_acc):
    """Accumulates masked squared-error sums per batch row.

    Grid is (nc, nt): nc batch slices (parallel -> one per TensorCore on v7x),
    nt time tiles (arbitrary -> sequential reduction on resident scratch).
    """
    t = pl.program_id(1)
    nt = pl.num_programs(1)
    bc, tile_t = dp_ref.shape

    @pl.when(t == 0)
    def _init():
        d_acc[...] = jnp.zeros_like(d_acc)
        p_acc[...] = jnp.zeros_like(p_acc)
        e_acc[...] = jnp.zeros_like(e_acc)

    lens = len_ref[...]                                              # (bc, 1) int32, resident
    col = jax.lax.broadcasted_iota(jnp.int32, (bc, tile_t), 1) + t * tile_t
    valid = col < lens                                               # shared by all 3 losses

    def accumulate(acc_ref, pred_ref, tgt_ref):
        # Cast to f32 before subtracting (bf16-safe; v5e has no bf16 VPU).
        diff = pred_ref[...].astype(jnp.float32) - tgt_ref[...].astype(jnp.float32)
        # where-select (not mask multiply): the last time tile may be partial and its
        # tail undefined; select keeps any NaN/Inf there out of the accumulator.
        acc_ref[...] += jnp.where(valid, diff * diff, 0.0)

    accumulate(d_acc, dp_ref, dt_ref)
    accumulate(p_acc, pp_ref, pt_ref)
    accumulate(e_acc, ep_ref, et_ref)

    @pl.when(t == nt - 1)
    def _finalize():
        # One cross-lane (XLU) reduce per loss, hoisted out of the hot loop.
        # Lane-dense (bc, 128) outputs -> unmasked stores.
        d_out[...] = jnp.broadcast_to(
            jnp.sum(d_acc[...], axis=1, keepdims=True), d_out.shape)
        p_out[...] = jnp.broadcast_to(
            jnp.sum(p_acc[...], axis=1, keepdims=True), p_out.shape)
        e_out[...] = jnp.broadcast_to(
            jnp.sum(e_acc[...], axis=1, keepdims=True), e_out.shape)


def stylespeech_loss2(mel, mel_target, log_d_predicted, log_d_target,
                      p_predicted, p_target, e_predicted, e_target,
                      src_len, mel_len, *, tile_t=4096,
                      vmem_budget_bytes=12 << 20):
    # mel / mel_target / mel_len never contribute: mel_loss is the literal 0
    # returned by the reference forward.
    del mel, mel_target, mel_len

    B, T = log_d_predicted.shape
    in_itemsize = jnp.dtype(log_d_predicted.dtype).itemsize

    # Clamp to T so src_len > T divides by the number of elements actually sliced,
    # matching PyTorch's [:src_l] semantics.  src_len == 0 yields 0/0 = NaN, which
    # matches torch.mean over an empty slice.
    lens_i32 = jnp.minimum(src_len.astype(jnp.int32), T)
    lens_col = lens_i32.reshape(B, 1)

    # --- grid / tile selection ------------------------------------------------
    # Working-set bytes per time column: 6 double-buffered streams + 3 f32 scratch.
    def bytes_per_col(rows):
        return (6 * 2 * in_itemsize + 3 * 4) * rows

    if bytes_per_col(B) * T <= vmem_budget_bytes or T <= 128:
        # Fast path: one resident (B, T) block; no padding, no per-step overhead.
        # TODO(synk): pathological huge-B / tiny-T inputs (T <= 128 but working set
        # over budget) would want batch tiling; irrelevant for StyleSpeech sizes.
        nc, tile_t = 1, T
    else:
        # Large B*T: software-pipeline over the time axis.  On v7x additionally
        # split the batch across both TensorCores when halves stay sublane-aligned.
        nc = 2 if B % 16 == 0 else 1
        rows = B // nc
        max_tt = max(128, (vmem_budget_bytes // bytes_per_col(rows)) // 128 * 128)
        tile_t = max(128, (min(tile_t, max_tt, T) // 128) * 128)

    bc = B // nc
    nt = pl.cdiv(T, tile_t)
    # NOTE: with bc < 8 the (bc, tile_t) blocks only occupy bc of 8 sublanes per
    # vreg; acceptable since small batches take the single-block fast path anyway.

    streams = (log_d_predicted, log_d_target, p_predicted, p_target,
               e_predicted, e_target)

    # If profiling ever shows exposed DMA latency, pipeline_mode=pl.Buffered(3)
    # on stream_spec is the next lever (lower priority than larger tiles).
    stream_spec = pl.BlockSpec((bc, tile_t), lambda c, t: (c, t))
    lens_spec = pl.BlockSpec((bc, 1), lambda c, t: (c, 0))       # resident over t
    row_out_spec = pl.BlockSpec((bc, 128), lambda c, t: (c, 0))  # lane-dense, written once
    row_out_shape = jax.ShapeDtypeStruct((B, 128), jnp.float32)

    grid_spec = pltpu.PrefetchScalarGridSpec(
        num_scalar_prefetch=0,
        grid=(nc, nt),
        in_specs=[lens_spec] + [stream_spec] * 6,
        out_specs=(row_out_spec, row_out_spec, row_out_spec),
        scratch_shapes=[pltpu.VMEM((bc, tile_t), jnp.float32)] * 3,
    )

    cost = pl.CostEstimate(
        flops=3 * 3 * B * T,
        transcendentals=0,
        bytes_accessed=6 * B * T * in_itemsize + B * 4 + 3 * B * 128 * 4,
    )

    d_rows, p_rows, e_rows = pl.pallas_call(
        _masked_sq_sum_kernel,
        out_shape=(row_out_shape, row_out_shape, row_out_shape),
        grid_spec=grid_spec,
        compiler_params=pltpu.CompilerParams(
            dimension_semantics=("parallel", "arbitrary")),
        cost_estimate=cost,
    )(lens_col, *streams)

    # Tiny epilogue on 3*B numbers: per-row 1/len then 1/B batch mean.
    lens_f = lens_i32.astype(jnp.float32)
    inv_b = 1.0 / B
    d_loss = jnp.sum(d_rows[:, 0] / lens_f) * inv_b
    p_loss = jnp.sum(p_rows[:, 0] / lens_f) * inv_b
    e_loss = jnp.sum(e_rows[:, 0] / lens_f) * inv_b
    return 0, d_loss, p_loss, e_loss


def _reference(log_d_p, log_d_t, p_p, p_t, e_p, e_t, src_len):
    B = log_d_p.shape[0]
    d = p = e = 0.0
    for b in range(B):
        s = int(src_len[b])
        d += jnp.mean((log_d_p[b, :s] - log_d_t[b, :s]) ** 2)
        p += jnp.mean((p_p[b, :s] - p_t[b, :s]) ** 2)
        e += jnp.mean((e_p[b, :s] - e_t[b, :s]) ** 2)
    return d / B, p / B, e / B


if __name__ == "__main__":
    key = jax.random.PRNGKey(0)
    B, T_src, T_mel, N_MEL = 2, 8, 16, 8

    ks = jax.random.split(key, 8)
    mel = jax.random.normal(ks[0], (B, T_mel, N_MEL), jnp.float32)
    mel_target = jax.random.normal(ks[1], (B, T_mel, N_MEL), jnp.float32)
    log_d_predicted = jax.random.normal(ks[2], (B, T_src), jnp.float32)
    log_d_target = jax.random.normal(ks[3], (B, T_src), jnp.float32)
    p_predicted = jax.random.normal(ks[4], (B, T_src), jnp.float32)
    p_target = jax.random.normal(ks[5], (B, T_src), jnp.float32)
    e_predicted = jax.random.normal(ks[6], (B, T_src), jnp.float32)
    e_target = jax.random.normal(ks[7], (B, T_src), jnp.float32)
    src_len = jnp.array([6, 8], jnp.int32)
    mel_len = jnp.array([12, 16], jnp.int32)

    mel_loss, d_loss, p_loss, e_loss = stylespeech_loss2(
        mel, mel_target, log_d_predicted, log_d_target,
        p_predicted, p_target, e_predicted, e_target, src_len, mel_len)
    jax.block_until_ready((d_loss, p_loss, e_loss))

    d_ref, p_ref, e_ref = _reference(log_d_predicted, log_d_target,
                                     p_predicted, p_target,
                                     e_predicted, e_target, src_len)
    assert mel_loss == 0
    assert jnp.allclose(d_loss, d_ref, rtol=1e-5, atol=1e-5)
    assert jnp.allclose(p_loss, p_ref, rtol=1e-5, atol=1e-5)
    assert jnp.allclose(e_loss, e_ref, rtol=1e-5, atol=1e-5)

    print("KERNEL_OK")
</pallas_src>

<mosaic_0001>
module attributes {stable_mosaic.version = 11 : i64} {
  func.func @_masked_sq_sum_kernel(%arg0: i32, %arg1: i32, %arg2: memref<2x1xi32, #tpu.memory_space<vmem>>, %arg3: memref<2x8xf32, #tpu.memory_space<vmem>>, %arg4: memref<2x8xf32, #tpu.memory_space<vmem>>, %arg5: memref<2x8xf32, #tpu.memory_space<vmem>>, %arg6: memref<2x8xf32, #tpu.memory_space<vmem>>, %arg7: memref<2x8xf32, #tpu.memory_space<vmem>>, %arg8: memref<2x8xf32, #tpu.memory_space<vmem>>, %arg9: memref<2x128xf32, #tpu.memory_space<vmem>>, %arg10: memref<2x128xf32, #tpu.memory_space<vmem>>, %arg11: memref<2x128xf32, #tpu.memory_space<vmem>>, %arg12: memref<2x8xf32, #tpu.memory_space<vmem>>, %arg13: memref<2x8xf32, #tpu.memory_space<vmem>>, %arg14: memref<2x8xf32, #tpu.memory_space<vmem>>) attributes {dimension_semantics = [#tpu.dimension_semantics<parallel>, #tpu.dimension_semantics<arbitrary>], iteration_bounds = array<i64: 1, 1>, scalar_prefetch = 0 : i64, scratch_operands = 3 : i64, tpu.core_type = #tpu.core_type<tc>, window_params = [{transform_indices = @transform_0, window_bounds = array<i64: 2, 1>}, {transform_indices = @transform_1, window_bounds = array<i64: 2, 8>}, {transform_indices = @transform_2, window_bounds = array<i64: 2, 8>}, {transform_indices = @transform_3, window_bounds = array<i64: 2, 8>}, {transform_indices = @transform_4, window_bounds = array<i64: 2, 8>}, {transform_indices = @transform_5, window_bounds = array<i64: 2, 8>}, {transform_indices = @transform_6, window_bounds = array<i64: 2, 8>}, {transform_indices = @transform_7, window_bounds = array<i64: 2, 128>}, {transform_indices = @transform_8, window_bounds = array<i64: 2, 128>}, {transform_indices = @transform_9, window_bounds = array<i64: 2, 128>}]} {
    %c0_i32 = arith.constant 0 : i32
    %0 = arith.cmpi eq, %arg1, %c0_i32 : i32
    %1 = arith.extui %0 : i1 to i32
    %c0_i32_0 = arith.constant 0 : i32
    %2 = arith.cmpi ne, %1, %c0_i32_0 : i32
    scf.if %2 {
      %cst_30 = arith.constant 0.000000e+00 : f32
      %40 = vector.broadcast %cst_30 : f32 to vector<2x8xf32>
      %c0_31 = arith.constant 0 : index
      %c0_32 = arith.constant 0 : index
      %41 = vector.load %arg12[%c0_31, %c0_32] : memref<2x8xf32, #tpu.memory_space<vmem>>, vector<2x8xf32>
      tpu.vector_store %arg12[%c0_31, %c0_32], %40 {strides = array<i32>} : memref<2x8xf32, #tpu.memory_space<vmem>>, vector<2x8xf32>,
      %cst_33 = arith.constant 0.000000e+00 : f32
      %42 = vector.broadcast %cst_33 : f32 to vector<2x8xf32>
      %c0_34 = arith.constant 0 : index
      %c0_35 = arith.constant 0 : index
      %43 = vector.load %arg13[%c0_34, %c0_35] : memref<2x8xf32, #tpu.memory_space<vmem>>, vector<2x8xf32>
      tpu.vector_store %arg13[%c0_34, %c0_35], %42 {strides = array<i32>} : memref<2x8xf32, #tpu.memory_space<vmem>>, vector<2x8xf32>,
      %cst_36 = arith.constant 0.000000e+00 : f32
      %44 = vector.broadcast %cst_36 : f32 to vector<2x8xf32>
      %c0_37 = arith.constant 0 : index
      %c0_38 = arith.constant 0 : index
      %45 = vector.load %arg14[%c0_37, %c0_38] : memref<2x8xf32, #tpu.memory_space<vmem>>, vector<2x8xf32>
      tpu.vector_store %arg14[%c0_37, %c0_38], %44 {strides = array<i32>} : memref<2x8xf32, #tpu.memory_space<vmem>>, vector<2x8xf32>,
    } else {
    }
    %c0 = arith.constant 0 : index
    %c0_1 = arith.constant 0 : index
    %3 = vector.load %arg2[%c0, %c0_1] : memref<2x1xi32, #tpu.memory_space<vmem>>, vector<2x1xi32>
    %4 = tpu.iota {dimensions = array<i32: 1>} : vector<2x8xi32>
    %c8_i32 = arith.constant 8 : i32
    %5 = arith.muli %arg1, %c8_i32 : i32
    %6 = vector.broadcast %5 : i32 to vector<2x8xi32>
    %7 = arith.addi %4, %6 : vector<2x8xi32>
    %8 = vector.broadcast %3 : vector<2x1xi32> to vector<2x8xi32>
    %9 = arith.cmpi slt, %7, %8 : vector<2x8xi32>
    %c0_2 = arith.constant 0 : index
    %c0_3 = arith.constant 0 : index
    %10 = vector.load %arg3[%c0_2, %c0_3] : memref<2x8xf32, #tpu.memory_space<vmem>>, vector<2x8xf32>
    %c0_4 = arith.constant 0 : index
    %c0_5 = arith.constant 0 : index
    %11 = vector.load %arg4[%c0_4, %c0_5] : memref<2x8xf32, #tpu.memory_space<vmem>>, vector<2x8xf32>
    %12 = arith.subf %10, %11 : vector<2x8xf32>
    %c0_6 = arith.constant 0 : index
    %c0_7 = arith.constant 0 : index
    %13 = vector.load %arg12[%c0_6, %c0_7] : memref<2x8xf32, #tpu.memory_space<vmem>>, vector<2x8xf32>
    %14 = arith.mulf %12, %12 : vector<2x8xf32>
    %cst = arith.constant 0.000000e+00 : f32
    %15 = vector.broadcast %cst : f32 to vector<2x8xf32>
    %16 = arith.select %9, %14, %15 : vector<2x8xi1>, vector<2x8xf32>
    %17 = arith.addf %13, %16 : vector<2x8xf32>
    %c0_8 = arith.constant 0 : index
    %c0_9 = arith.constant 0 : index
    %18 = vector.load %arg12[%c0_8, %c0_9] : memref<2x8xf32, #tpu.memory_space<vmem>>, vector<2x8xf32>
    tpu.vector_store %arg12[%c0_8, %c0_9], %17 {strides = array<i32>} : memref<2x8xf32, #tpu.memory_space<vmem>>, vector<2x8xf32>,
    %c0_10 = arith.constant 0 : index
    %c0_11 = arith.constant 0 : index
    %19 = vector.load %arg5[%c0_10, %c0_11] : memref<2x8xf32, #tpu.memory_space<vmem>>, vector<2x8xf32>
    %c0_12 = arith.constant 0 : index
    %c0_13 = arith.constant 0 : index
    %20 = vector.load %arg6[%c0_12, %c0_13] : memref<2x8xf32, #tpu.memory_space<vmem>>, vector<2x8xf32>
    %21 = arith.subf %19, %20 : vector<2x8xf32>
    %c0_14 = arith.constant 0 : index
    %c0_15 = arith.constant 0 : index
    %22 = vector.load %arg13[%c0_14, %c0_15] : memref<2x8xf32, #tpu.memory_space<vmem>>, vector<2x8xf32>
    %23 = arith.mulf %21, %21 : vector<2x8xf32>
    %cst_16 = arith.constant 0.000000e+00 : f32
    %24 = vector.broadcast %cst_16 : f32 to vector<2x8xf32>
    %25 = arith.select %9, %23, %24 : vector<2x8xi1>, vector<2x8xf32>
    %26 = arith.addf %22, %25 : vector<2x8xf32>
    %c0_17 = arith.constant 0 : index
    %c0_18 = arith.constant 0 : index
    %27 = vector.load %arg13[%c0_17, %c0_18] : memref<2x8xf32, #tpu.memory_space<vmem>>, vector<2x8xf32>
    tpu.vector_store %arg13[%c0_17, %c0_18], %26 {strides = array<i32>} : memref<2x8xf32, #tpu.memory_space<vmem>>, vector<2x8xf32>,
    %c0_19 = arith.constant 0 : index
    %c0_20 = arith.constant 0 : index
    %28 = vector.load %arg7[%c0_19, %c0_20] : memref<2x8xf32, #tpu.memory_space<vmem>>, vector<2x8xf32>
    %c0_21 = arith.constant 0 : index
    %c0_22 = arith.constant 0 : index
    %29 = vector.load %arg8[%c0_21, %c0_22] : memref<2x8xf32, #tpu.memory_space<vmem>>, vector<2x8xf32>
    %30 = arith.subf %28, %29 : vector<2x8xf32>
    %c0_23 = arith.constant 0 : index
    %c0_24 = arith.constant 0 : index
    %31 = vector.load %arg14[%c0_23, %c0_24] : memref<2x8xf32, #tpu.memory_space<vmem>>, vector<2x8xf32>
    %32 = arith.mulf %30, %30 : vector<2x8xf32>
    %cst_25 = arith.constant 0.000000e+00 : f32
    %33 = vector.broadcast %cst_25 : f32 to vector<2x8xf32>
    %34 = arith.select %9, %32, %33 : vector<2x8xi1>, vector<2x8xf32>
    %35 = arith.addf %31, %34 : vector<2x8xf32>
    %c0_26 = arith.constant 0 : index
    %c0_27 = arith.constant 0 : index
    %36 = vector.load %arg14[%c0_26, %c0_27] : memref<2x8xf32, #tpu.memory_space<vmem>>, vector<2x8xf32>
    tpu.vector_store %arg14[%c0_26, %c0_27], %35 {strides = array<i32>} : memref<2x8xf32, #tpu.memory_space<vmem>>, vector<2x8xf32>,
    %c0_i32_28 = arith.constant 0 : i32
    %37 = arith.cmpi eq, %arg1, %c0_i32_28 : i32
    %38 = arith.extui %37 : i1 to i32
    %c0_i32_29 = arith.constant 0 : i32
    %39 = arith.cmpi ne, %38, %c0_i32_29 : i32
    scf.if %39 {
      %c0_30 = arith.constant 0 : index
      %c0_31 = arith.constant 0 : index
      %40 = vector.load %arg12[%c0_30, %c0_31] : memref<2x8xf32, #tpu.memory_space<vmem>>, vector<2x8xf32>
      %cst_32 = arith.constant dense<0.000000e+00> : vector<2xf32>
      %41 = vector.multi_reduction <add>, %40, %cst_32 [1] : vector<2x8xf32> to vector<2xf32>
      %42 = vector.shape_cast %41 : vector<2xf32> to vector<2x1xf32>
      %43 = vector.shape_cast %42 : vector<2x1xf32> to vector<2x1xf32>
      %44 = vector.broadcast %43 : vector<2x1xf32> to vector<2x128xf32>
      %c0_33 = arith.constant 0 : index
      %c0_34 = arith.constant 0 : index
      %45 = vector.load %arg9[%c0_33, %c0_34] : memref<2x128xf32, #tpu.memory_space<vmem>>, vector<2x128xf32>
      tpu.vector_store %arg9[%c0_33, %c0_34], %44 {strides = array<i32>} : memref<2x128xf32, #tpu.memory_space<vmem>>, vector<2x128xf32>,
      %c0_35 = arith.constant 0 : index
      %c0_36 = arith.constant 0 : index
      %46 = vector.load %arg13[%c0_35, %c0_36] : memref<2x8xf32, #tpu.memory_space<vmem>>, vector<2x8xf32>
      %cst_37 = arith.constant dense<0.000000e+00> : vector<2xf32>
      %47 = vector.multi_reduction <add>, %46, %cst_37 [1] : vector<2x8xf32> to vector<2xf32>
      %48 = vector.shape_cast %47 : vector<2xf32> to vector<2x1xf32>
      %49 = vector.shape_cast %48 : vector<2x1xf32> to vector<2x1xf32>
      %50 = vector.broadcast %49 : vector<2x1xf32> to vector<2x128xf32>
      %c0_38 = arith.constant 0 : index
      %c0_39 = arith.constant 0 : index
      %51 = vector.load %arg10[%c0_38, %c0_39] : memref<2x128xf32, #tpu.memory_space<vmem>>, vector<2x128xf32>
      tpu.vector_store %arg10[%c0_38, %c0_39], %50 {strides = array<i32>} : memref<2x128xf32, #tpu.memory_space<vmem>>, vector<2x128xf32>,
      %c0_40 = arith.constant 0 : index
      %c0_41 = arith.constant 0 : index
      %52 = vector.load %arg14[%c0_40, %c0_41] : memref<2x8xf32, #tpu.memory_space<vmem>>, vector<2x8xf32>
      %cst_42 = arith.constant dense<0.000000e+00> : vector<2xf32>
      %53 = vector.multi_reduction <add>, %52, %cst_42 [1] : vector<2x8xf32> to vector<2xf32>
      %54 = vector.shape_cast %53 : vector<2xf32> to vector<2x1xf32>
      %55 = vector.shape_cast %54 : vector<2x1xf32> to vector<2x1xf32>
      %56 = vector.broadcast %55 : vector<2x1xf32> to vector<2x128xf32>
      %c0_43 = arith.constant 0 : index
      %c0_44 = arith.constant 0 : index
      %57 = vector.load %arg11[%c0_43, %c0_44] : memref<2x128xf32, #tpu.memory_space<vmem>>, vector<2x128xf32>
      tpu.vector_store %arg11[%c0_43, %c0_44], %56 {strides = array<i32>} : memref<2x128xf32, #tpu.memory_space<vmem>>, vector<2x128xf32>,
    } else {
    }
    return
  }
  func.func @transform_0(%arg0: i32, %arg1: i32) -> (i32, i32) {
    %c0_i32 = arith.constant 0 : i32
    %c0_i32_0 = arith.constant 0 : i32
    return %arg0, %c0_i32 : i32, i32
  }
  func.func @transform_1(%arg0: i32, %arg1: i32) -> (i32, i32) {
    %c0_i32 = arith.constant 0 : i32
    return %arg0, %arg1 : i32, i32
  }
  func.func @transform_2(%arg0: i32, %arg1: i32) -> (i32, i32) {
    %c0_i32 = arith.constant 0 : i32
    return %arg0, %arg1 : i32, i32
  }
  func.func @transform_3(%arg0: i32, %arg1: i32) -> (i32, i32) {
    %c0_i32 = arith.constant 0 : i32
    return %arg0, %arg1 : i32, i32
  }
  func.func @transform_4(%arg0: i32, %arg1: i32) -> (i32, i32) {
    %c0_i32 = arith.constant 0 : i32
    return %arg0, %arg1 : i32, i32
  }
  func.func @transform_5(%arg0: i32, %arg1: i32) -> (i32, i32) {
    %c0_i32 = arith.constant 0 : i32
    return %arg0, %arg1 : i32, i32
  }
  func.func @transform_6(%arg0: i32, %arg1: i32) -> (i32, i32) {
    %c0_i32 = arith.constant 0 : i32
    return %arg0, %arg1 : i32, i32
  }
  func.func @transform_7(%arg0: i32, %arg1: i32) -> (i32, i32) {
    %c0_i32 = arith.constant 0 : i32
    %c0_i32_0 = arith.constant 0 : i32
    return %arg0, %c0_i32 : i32, i32
  }
  func.func @transform_8(%arg0: i32, %arg1: i32) -> (i32, i32) {
    %c0_i32 = arith.constant 0 : i32
    %c0_i32_0 = arith.constant 0 : i32
    return %arg0, %c0_i32 : i32, i32
  }
  func.func @transform_9(%arg0: i32, %arg1: i32) -> (i32, i32) {
    %c0_i32 = arith.constant 0 : i32
    %c0_i32_0 = arith.constant 0 : i32
    return %arg0, %c0_i32 : i32, i32
  }
}

</mosaic_0001>

<bundles_post_ra>
// kernel: tpu_custom_call.1
= control target key start
LH: loop header
LB: loop body
LE: loop exit
PB: predicated region body
PF: predicated region fallthrough
CT: control target
= control target key end

     0   :  { %15 = vsyncpa [#allocation6], 0  ;;  %vm35_vm0 = vcmask 58368   ;;  %v209_v1 = vmov 0   ;;  %v210_v2 = vmov 0.0   ;;  %s344_s0 = inlined_call_operand.vmem [shape: s32[2,1], index: 0, kind: input, shape index: {}]   ;;  %s345_s1 = inlined_call_operand.vmem [shape: f32[2,8], index: 1, kind: input, shape index: {}]   ;;  %s346_s2 = inlined_call_operand.vmem [shape: f32[2,8], index: 2, kind: input, shape index: {}]   ;;  %s347_s3 = inlined_call_operand.vmem [shape: f32[2,8], index: 3, kind: input, shape index: {}]   ;;  %s348_s4 = inlined_call_operand.vmem [shape: f32[2,8], index: 4, kind: input, shape index: {}]   ;;  %s349_s5 = inlined_call_operand.vmem [shape: f32[2,8], index: 5, kind: input, shape index: {}]   ;;  %s350_s6 = inlined_call_operand.vmem [shape: f32[2,8], index: 6, kind: input, shape index: {}]   ;;  %s351_s7 = inlined_call_operand.hbm [shape: f32[2,128], index: 7, kind: output, shape index: {0}]   ;;  %s352_s8 = inlined_call_operand.hbm [shape: f32[2,128], index: 8, kind: output, shape index: {1}]   ;;  %s353_s9 = inlined_call_operand.hbm [shape: f32[2,128], index: 9, kind: output, shape index: {2}]  }
   0x1   :  { %v39_v0 = vld [vmem:[%s344_s0] sm:$0x3]  ;;  %138 = vset.pattern.permute.xlu0 %v209_v1  ;;  %36 = vst.msk [vmem:[#allocation2] sm:$0x3] %vm35_vm0, %v210_v2  ;;  %37 = vst.msk [vmem:[#allocation3] sm:$0x3] %vm35_vm0, %v210_v2 }
   0x2   :  { %46 = vperm.xlu0 %138, %v39_v0   ;;  %38 = vst.msk [vmem:[#allocation4] sm:$0x3] %vm35_vm0, %v210_v2 }
   0x3   :  { %16 = vsyncpa [#allocation8], 0  ;;  %v49_v3 = vld [vmem:[%s345_s1] sm:$0x3]  ;;  %v40_v9 = vlaneseq  ;;  %s211_s1 = smov [#allocation7]  }
   0x4   :  { %v50_v4 = vld [vmem:[%s346_s2] sm:$0x3]  ;;  %s108_s2 = sshll.u32 %s211_s1, 4  ;;  %s109_s2 = int_to_ptr.vmem [resolvable:$true] %s108_s2 }
   0x5   :  { %v58_v5 = vld [vmem:[%s347_s3] sm:$0x3]  ;;  %v51_v10 = vsub.f32 %v49_v3, %v50_v4  ;;  %v41_v13 = vand.u32 127, %v40_v9  ;;  %s212_s3 = smov [#allocation5]   ;;  %s139_s22 = scalar_lea.vmem %s109_s2, 32 }
   0x6   :  { %v59_v6 = vld [vmem:[%s348_s4] sm:$0x3]  ;;  %s98_s4 = sshll.u32 %s212_s3, 4  ;;  %p140_p0 = scmp.ne.s32.totalorder %s109_s2, %s139_s22  ;;  %s294_s4 = int_to_ptr.vmem [resolvable:$true] %s98_s4 }
   0x7   :  { %v66_v7 = vld [vmem:[%s349_s5] sm:$0x3]  ;;  %v60_v11 = vsub.f32 %v58_v5, %v59_v6  ;;  %v53_v14 = vmul.f32 %v51_v10, %v51_v10  ;;  %s213_s5 = smov [#allocation9]   ;;  %p144_p1 = scmp.lt.s32.totalorder %s109_s2, %s109_s2 }
   0x8   :  { %v67_v8 = vld [vmem:[%s350_s6] sm:$0x3]  ;;  %v52_v18 = vld [vmem:[#allocation2] sm:$0x3]  ;;  %v61_v19 = vld [vmem:[#allocation3] sm:$0x3]  ;;  %p145_p2 = scmp.lt.s32.totalorder %s139_s22, %s139_s22 }
   0x9   :  { %v68_v12 = vsub.f32 %v66_v7, %v67_v8  ;;  %v62_v15 = vmul.f32 %v60_v11, %v60_v11  ;;  %v69_v20 = vld [vmem:[#allocation4] sm:$0x3]  ;;  %s118_s6 = sshll.u32 %s213_s5, 4  ;;  %s296_s6 = int_to_ptr.vmem [resolvable:$true] %s118_s6 }
   0xa   :  { %p146_p3 = por %p145_p2, %p144_p1 }
   0xb   :  { %v70_v16 = vmul.f32 %v68_v12, %v68_v12 }
   0xc   :  { %p147_p4 = pnand %p146_p3, %p140_p0 }
  0x81   :  { %v47_v17 = vpop.permute.xlu0 %46 }
  0x82   :  { %vm48_vm1 = vcmp.lt.s32.totalorder %v41_v13, %v47_v17 }
  0x83   :  { %v54_v21 = vsel %vm48_vm1, %v53_v14, 0.0  ;;  %v63_v22 = vsel %vm48_vm1, %v62_v15, 0.0  ;;  %v71_v23 = vsel %vm48_vm1, %v70_v16, 0.0 }
  0x84   :  { %v55_v24 = vadd.f32 %v54_v21, %v52_v18  ;;  %v64_v25 = vadd.f32 %v63_v22, %v61_v19  ;;  %v72_v26 = vadd.f32 %v71_v23, %v69_v20 }
  0x86   :  { %57 = vst.msk [vmem:[#allocation2] sm:$0x3] %vm35_vm0, %v55_v24  ;;  %65 = vst.msk [vmem:[#allocation3] sm:$0x3] %vm35_vm0, %v64_v25 }
  0x87   :  { %73 = vst.msk [vmem:[#allocation4] sm:$0x3] %vm35_vm0, %v72_v26 }
  0x8d   :  { %v82_v27 = vld [vmem:[#allocation3] sm:$0x3]  ;;  %v77_v28 = vld [vmem:[#allocation2] sm:$0x3] }
  0x8e   :  { %v83_v29 = vsel %vm35_vm0, %v82_v27, 0.0  ;;  %v78_v30 = vsel %vm35_vm0, %v77_v28, 0.0  ;;  %v87_v31 = vld [vmem:[#allocation4] sm:$0x3] }
  0x8f   :  { %84 = vadd.xlane.f32.xlu0 %v83_v29  ;;  %79 = vadd.xlane.f32.xlu1 %v78_v30  ;;  %v88_v32 = vsel %vm35_vm0, %v87_v31, 0.0 }
  0x93   :  { %89 = vadd.xlane.f32.xlu1 %v88_v32 }
 0x11c   :  { %v85_v33 = vpop.xlane.xlu0 %84  ;;  %v80_v34 = vpop.xlane.xlu1 %79 }
 0x11d   :  { %86 = vst [vmem:[#allocation7] sm:$0x3] %v85_v33  ;;  %81 = vst [vmem:[#allocation5] sm:$0x3] %v80_v34 }
 0x11e   :  { %150 = shalt.err (!%p147_p4)
}
 0x11f   :  { %s151_s25 = scalar_lea.hbm %s352_s8, 32 }
 0x120   :  { %p152_p5 = scmp.ne.s32.totalorder %s352_s8, %s151_s25  ;;  %p155_p6 = scmp.lt.u32.totalorder %s151_s25, %s352_s8 }
 0x122   :  { %p157_p7 = pnand %p155_p6, %p152_p5 }
 0x124   :  { %160 = shalt.err (!%p157_p7)
}
 0x125   :  { %111 = dma.vmem_to_hbm [thread:$0]  %s109_s2, 32, %s352_s8, [#allocation8]  }
 0x126   :  { %s161_s11 = scalar_lea.vmem %s294_s4, 32  ;;  %p166_p9 = scmp.lt.s32.totalorder %s294_s4, %s294_s4 }
 0x127   :  { %p162_p8 = scmp.ne.s32.totalorder %s294_s4, %s161_s11  ;;  %p167_p10 = scmp.lt.s32.totalorder %s161_s11, %s161_s11 }
 0x129   :  { %p168_p11 = por %p167_p10, %p166_p9 }
 0x12b   :  { %p169_p12 = pnand %p168_p11, %p162_p8 }
 0x12d   :  { %172 = shalt.err (!%p169_p12)
}
 0x12e   :  { %s173_s14 = scalar_lea.hbm %s351_s7, 32 }
 0x12f   :  { %p174_p13 = scmp.ne.s32.totalorder %s351_s7, %s173_s14  ;;  %p177_p0 = scmp.lt.u32.totalorder %s173_s14, %s351_s7 }
 0x131   :  { %p179_p1 = pnand %p177_p0, %p174_p13 }
 0x133   :  { %182 = shalt.err (!%p179_p1)
}
 0x134   :  { %101 = dma.vmem_to_hbm [thread:$0]  %s294_s4, 32, %s351_s7, [#allocation6]   ;;  %v90_v35 = vpop.xlane.xlu1 %89 }
 0x135   :  { %91 = vst [vmem:[#allocation9] sm:$0x3] %v90_v35  ;;  %s183_s19 = scalar_lea.vmem %s296_s6, 32  ;;  %p188_p3 = scmp.lt.s32.totalorder %s296_s6, %s296_s6 }
 0x136   :  { %p184_p2 = scmp.ne.s32.totalorder %s296_s6, %s183_s19  ;;  %p189_p4 = scmp.lt.s32.totalorder %s183_s19, %s183_s19 }
 0x138   :  { %p190_p5 = por %p189_p4, %p188_p3 }
 0x13a   :  { %p191_p6 = pnand %p190_p5, %p184_p2 }
 0x13c   :  { %194 = shalt.err (!%p191_p6)
}
 0x13d   :  { %s195_s1 = scalar_lea.hbm %s353_s9, 32 }
 0x13e   :  { %p196_p7 = scmp.ne.s32.totalorder %s353_s9, %s195_s1  ;;  %p199_p8 = scmp.lt.u32.totalorder %s195_s1, %s353_s9 }
 0x140   :  { %p201_p9 = pnand %p199_p8, %p196_p7 }
 0x142   :  { %204 = shalt.err (!%p201_p9)
}
 0x143   :  { %121 = dma.vmem_to_hbm [thread:$0]  %s296_s6, 32, %s353_s9, [#allocation8]  }
 0x144   :  { %205 = dma.done.wait [#allocation6], 32  }
 0x145   :  { %206 = vsyncadd [#allocation6], 4294967264 }
 0x146   :  { %207 = dma.done.wait [#allocation8], 64  }
 0x147   :  { %208 = vsyncadd [#allocation8], 4294967232 }
 0x148   :  { %131 = vsyncpa [#allocation6], 1 }
 0x149   :  { %132 = vsyncpa [#allocation8], 1 }

</bundles_post_ra>
